<compile_context>
chip_gen: v7x
topology: tpu7x:2x2x1
jax: 0.10.0
libtpu: 0.0.40
codegen_flags: <defaults>
</compile_context>

<pallas_src>
import jax
import jax.numpy as jnp
from jax import lax
from jax.experimental import pallas as pl
from jax.experimental.pallas import tpu as pltpu


_MIN_BLOCK_BYTES = 2 << 20   # >= ~2 MiB of input per grid step keeps the
                             # ~0.35 us fixed per-step overhead under ~10%


def _vmem_params():
    """(working-set budget, vmem_limit_bytes), generation-aware.

    Conservative 20 / 32 MiB on v7x (64 MiB physical VMEM, 2 TCs sharing it),
    larger 44 / 64 MiB tiles on v5e / v6e (128 MiB physical VMEM).
    """
    phys = 64 << 20                       # assume the smallest (v7x) if unknown
    try:
        cap = getattr(pltpu.get_tpu_info(), "vmem_capacity_bytes", None)
        if cap:
            phys = int(cap)
    except Exception:
        pass
    if phys >= (96 << 20):                # v5e / v6e: 128 MiB physical
        return 44 << 20, 64 << 20
    return 20 << 20, 32 << 20             # v7x: 64 MiB physical
    # TODO(synk): optionally add pipeline_mode=pl.Buffered(3) on the input
    # BlockSpecs for the 128 MiB parts once the working set allows it.


def _pick_row_split(R, L):
    """Split factor G for viewing [R, L] as [R*G, L/G] (free reshape).

    Guarantees >= 2 blocks on the "parallel" row axis whenever the shapes
    allow it (v7x has two TensorCores — with a single row block one idles),
    and makes the row count a multiple of 8 for small / awkward R.
    """
    if R % 8 == 0 and R >= 16:
        return 1
    for G in (2, 4, 8):
        if L % G:
            continue
        if L // G < 128:
            break                          # don't shred the lane axis
        if (R * G) % 8 == 0 and R * G >= 16:
            return G
    return 1


def _row_tile_divisors(R_eff):
    """Multiples of 8 dividing R_eff, ascending; [R_eff] if there are none."""
    if R_eff % 8 != 0:
        return [R_eff]
    m = R_eff // 8
    divs = set()
    i = 1
    while i * i <= m:
        if m % i == 0:
            divs.add(8 * i)
            divs.add(8 * (m // i))
        i += 1
    return sorted(divs)


def _pick_tiles(R_eff, L_eff, bytes_pair, budget, max_tile_l=None):
    """Budget-driven (tile_r, tile_l).

    Small row tiles first (keeps the (tile_r, 128) accumulator in vregs) with
    the largest affordable lane tile; grow the row tile only when the lane
    axis is exhausted (L_eff caps tile_l) and the block is not yet MiB-scale.
    """
    if L_eff < 128:
        tl_min = tl_max = L_eff            # full-extent lane block
    else:
        tl_min = 128
        tl_max = pl.cdiv(L_eff, 128) * 128  # cover L_eff; tail block is masked
        if max_tile_l is not None:
            tl_max = max(tl_min, min(tl_max, max_tile_l))

    def lane_tile_for(tr):
        # double-buffered inputs + double-buffered (tr,128) f32 output block
        # + slack for the per-chunk f32 temporaries / fori carry
        fixed = (2 + 10) * tr * 128 * 4
        lane_budget = (budget - fixed) // max(2 * tr * bytes_pair, 1)
        if L_eff < 128:
            return tl_max if lane_budget >= tl_max else 0
        tl = min(tl_max, (lane_budget // 128) * 128)
        return tl if tl >= tl_min else 0

    cands = _row_tile_divisors(R_eff)
    if R_eff >= 16:
        pref = [c for c in cands if c <= R_eff // 2]
        if pref:
            cands = pref                   # keep >= 2 "parallel" row blocks

    choice = None
    for tr in cands:                       # ascending: small row tiles first
        tl = lane_tile_for(tr)
        if tl == 0:
            break                          # bigger row tiles only get worse
        choice = (tr, tl)
        if tr * tl * bytes_pair >= _MIN_BLOCK_BYTES:
            break                          # block is already MiB-scale
    if choice is None:
        # R_eff has no affordable multiple-of-8 divisor (degenerate case);
        # fall back to the minimal legal tiles and rely on budget->limit slack.
        choice = (cands[0], tl_min)
    return choice


def _make_bce_rowsum_kernel(L_eff, tile_r, tile_l, nj):
    """Accumulate per-row, per-lane BCE partial sums into the resident
    (tile_r, out_lanes) output block across the nj lane blocks."""

    def bce_chunk(pred_ref, label_ref, start):
        # per-chunk *ref* slices: no full-tile f32 intermediate, native-dtype
        # loads, cast to f32 only on-chip
        x = pred_ref[:, pl.ds(start, 128)].astype(jnp.float32)
        y = label_ref[:, pl.ds(start, 128)].astype(jnp.float32)
        # logits-stable BCE-with-logits == BCE(sigmoid(x), y) up to f32
        # rounding; torch's -100 log clamp only differs for |x| > ~88.
        return jnp.maximum(x, 0.0) - x * y + jnp.log1p(jnp.exp(-jnp.abs(x)))

    if tile_l < 128:
        # tiny-L corner case: one full-extent lane block (nj == 1), one chunk
        def tiny_kernel(pred_ref, label_ref, out_ref):
            x = pred_ref[...].astype(jnp.float32)
            y = label_ref[...].astype(jnp.float32)
            out_ref[...] = (jnp.maximum(x, 0.0) - x * y
                            + jnp.log1p(jnp.exp(-jnp.abs(x))))
        return tiny_kernel

    num_chunks = tile_l // 128
    rem = L_eff - (nj - 1) * tile_l        # valid lanes in the last lane block
    needs_mask = rem != tile_l
    unroll = min(8, num_chunks)

    def accumulate_full(pred_ref, label_ref, out_ref):
        def body(c, acc):
            start = pl.multiple_of(c * 128, 128)
            return acc + bce_chunk(pred_ref, label_ref, start)
        out_ref[...] = lax.fori_loop(0, num_chunks, body, out_ref[...],
                                     unroll=unroll)

    def accumulate_masked(pred_ref, label_ref, out_ref, j):
        # only the tail block pays for the lane mask; chunks entirely out of
        # bounds are skipped
        valid_chunks = pl.cdiv(rem, 128)

        def body(c, acc):
            start = pl.multiple_of(c * 128, 128)
            bce = bce_chunk(pred_ref, label_ref, start)
            col = (j * tile_l + start
                   + lax.broadcasted_iota(jnp.int32, bce.shape, 1))
            return acc + jnp.where(col < L_eff, bce, 0.0)

        out_ref[...] = lax.fori_loop(0, valid_chunks, body, out_ref[...],
                                     unroll=min(unroll, valid_chunks))

    def kernel(pred_ref, label_ref, out_ref):
        j = pl.program_id(1)

        @pl.when(j == 0)
        def _():
            out_ref[...] = jnp.zeros_like(out_ref)

        if not needs_mask:
            accumulate_full(pred_ref, label_ref, out_ref)
        elif nj == 1:
            accumulate_masked(pred_ref, label_ref, out_ref, j)
        else:
            @pl.when(j < nj - 1)
            def _():
                accumulate_full(pred_ref, label_ref, out_ref)

            @pl.when(j == nj - 1)
            def _():
                accumulate_masked(pred_ref, label_ref, out_ref, j)

    return kernel


def _bce_row_sums(pred2d, label2d, *, max_tile_l=None):
    """pred2d, label2d: [R, L] (any float/int dtype) -> [R] f32 row sums of
    BCE(sigmoid(pred), label)."""
    R, L = pred2d.shape
    assert label2d.shape == (R, L)
    if max_tile_l is not None:
        assert max_tile_l % 128 == 0

    budget, vmem_limit = _vmem_params()
    bytes_pair = pred2d.dtype.itemsize + label2d.dtype.itemsize

    # view [R, L] as [R*G, L/G] (contiguous reshape, no data movement) so the
    # "parallel" row axis gets >= 2 blocks and is a multiple of 8
    G = _pick_row_split(R, L)
    R_eff, L_eff = R * G, L // G
    if G > 1:
        pred2d = pred2d.reshape(R_eff, L_eff)
        label2d = label2d.reshape(R_eff, L_eff)

    tile_r, tile_l = _pick_tiles(R_eff, L_eff, bytes_pair, budget, max_tile_l)
    out_lanes = 128 if tile_l >= 128 else tile_l
    ni = R_eff // tile_r
    nj = pl.cdiv(L_eff, tile_l)

    kernel = _make_bce_rowsum_kernel(L_eff, tile_r, tile_l, nj)

    lane_partials = pl.pallas_call(
        kernel,
        out_shape=jax.ShapeDtypeStruct((R_eff, out_lanes), jnp.float32),
        grid_spec=pltpu.PrefetchScalarGridSpec(
            num_scalar_prefetch=0,
            grid=(ni, nj),
            in_specs=[
                pl.BlockSpec((tile_r, tile_l), lambda i, j: (i, j)),
                pl.BlockSpec((tile_r, tile_l), lambda i, j: (i, j)),
            ],
            # lane-dense accumulator output (unmasked stores), resident over j
            out_specs=pl.BlockSpec((tile_r, out_lanes), lambda i, j: (i, 0)),
        ),
        compiler_params=pltpu.CompilerParams(
            dimension_semantics=("parallel", "arbitrary"),
            vmem_limit_bytes=vmem_limit,
        ),
    )(pred2d, label2d)

    # fold the lane-dense partials (and the G lane-groups) in plain XLA
    return jnp.sum(lane_partials.reshape(R, G * out_lanes), axis=-1)   # [R]


def binary_loss_ce(pred, label, loss_weight=1.0, reduction="mean"):
    """BinaryLoss(loss_type='ce') forward.

    pred:  [N, C, H, W] raw scores (pre-sigmoid), any float dtype
    label: [N, C, H, W] binary targets in {0, 1} (any dtype; bf16/int8 one-hot
           halves-or-better the HBM traffic vs f32)
    """
    N, C, H, W = pred.shape
    assert label.shape == pred.shape
    R, L = N * C, H * W

    pred2d = pred.reshape(R, L)
    label2d = label.reshape(R, L)

    row_sums = _bce_row_sums(pred2d, label2d)             # [R] f32
    per_class = row_sums.reshape(N, C) / float(L)         # mean over (H, W)
    per_sample = jnp.sum(per_class, axis=1) / float(C)    # loss / num_classes

    # weight_reduce_loss with weight=None, avg_factor=None
    if reduction == "mean":
        loss = jnp.mean(per_sample)
    elif reduction == "sum":
        loss = jnp.sum(per_sample)
    else:  # 'none'
        loss = per_sample
    # TODO(synk): 'cbce'/'dice'/'ce_dice' variants, class_weight, elementwise
    # weight, avg_factor, and utils.batch_make_one_hot (class-index labels)
    # are not wired up (module defaults: loss_type='ce', class_weight=None,
    # weight=None, avg_factor=None, label pre-one-hot).
    return loss_weight * loss


def _reference(pred, label):
    # torch semantics: sigmoid + BCE with logs clamped at -100
    p = jax.nn.sigmoid(pred.astype(jnp.float32))
    y = label.astype(jnp.float32)
    bce = -(y * jnp.maximum(jnp.log(p), -100.0)
            + (1.0 - y) * jnp.maximum(jnp.log1p(-p), -100.0))
    per_class = jnp.mean(bce, axis=(2, 3))                # [N, C]
    per_sample = jnp.sum(per_class, axis=1) / pred.shape[1]
    return jnp.mean(per_sample)


if __name__ == "__main__":
    key = jax.random.PRNGKey(0)
    k1, k2, k3, k4 = jax.random.split(key, 4)

    # primary shape, matching the module's [N, C, H, W] one-hot inputs
    N, C, H, W = 2, 4, 16, 16
    pred = jax.random.normal(k1, (N, C, H, W), dtype=jnp.float32)
    label = (jax.random.uniform(k2, (N, C, H, W)) > 0.5).astype(jnp.float32)

    loss = jax.block_until_ready(binary_loss_ce(pred, label))
    ref = jax.block_until_ready(_reference(pred, label))
    assert jnp.allclose(loss, ref, rtol=1e-4, atol=1e-6), (loss, ref)

    # secondary check: bf16 pred + bf16 one-hot label (reduced-byte native DMA)
    # and a spatial size that is not a multiple of the lane tile, forcing the
    # masked partial-last-block path (max_tile_l=128 -> several lane blocks).
    N2, C2, H2, W2 = 2, 4, 16, 20          # L = 320
    pred2 = jax.random.normal(k3, (N2, C2, H2, W2), dtype=jnp.bfloat16)
    label2 = (jax.random.uniform(k4, (N2, C2, H2, W2)) > 0.5).astype(jnp.bfloat16)

    R2, L2 = N2 * C2, H2 * W2
    row_sums2 = _bce_row_sums(pred2.reshape(R2, L2), label2.reshape(R2, L2),
                              max_tile_l=128)                         # [R2]
    loss2 = jnp.mean(jnp.sum(row_sums2.reshape(N2, C2) / float(L2), axis=1) / C2)
    ref2 = _reference(pred2, label2)
    loss2, ref2 = jax.block_until_ready((loss2, ref2))
    assert jnp.allclose(loss2, ref2, rtol=1e-4, atol=1e-6), (loss2, ref2)

    print("KERNEL_OK")
</pallas_src>

<mosaic_0001>
module attributes {stable_mosaic.version = 11 : i64} {
  func.func @kernel(%arg0: i32, %arg1: i32, %arg2: memref<8x128xf32, #tpu.memory_space<vmem>>, %arg3: memref<8x128xf32, #tpu.memory_space<vmem>>, %arg4: memref<8x128xf32, #tpu.memory_space<vmem>>) attributes {dimension_semantics = [#tpu.dimension_semantics<parallel>, #tpu.dimension_semantics<arbitrary>], iteration_bounds = array<i64: 2, 1>, scalar_prefetch = 0 : i64, scratch_operands = 0 : i64, tpu.core_type = #tpu.core_type<tc>, window_params = [{transform_indices = @transform_0, window_bounds = array<i64: 8, 128>}, {transform_indices = @transform_1, window_bounds = array<i64: 8, 128>}, {transform_indices = @transform_2, window_bounds = array<i64: 8, 128>}]} {
    %c0_i32 = arith.constant 0 : i32
    %0 = arith.cmpi eq, %arg1, %c0_i32 : i32
    %1 = arith.extui %0 : i1 to i32
    %c0_i32_0 = arith.constant 0 : i32
    %2 = arith.cmpi ne, %1, %c0_i32_0 : i32
    scf.if %2 {
      %cst_8 = arith.constant 0.000000e+00 : f32
      %22 = vector.broadcast %cst_8 : f32 to vector<8x128xf32>
      %c0_9 = arith.constant 0 : index
      %c0_10 = arith.constant 0 : index
      %23 = vector.load %arg4[%c0_9, %c0_10] : memref<8x128xf32, #tpu.memory_space<vmem>>, vector<8x128xf32>
      tpu.vector_store %arg4[%c0_9, %c0_10], %22 {strides = array<i32>} : memref<8x128xf32, #tpu.memory_space<vmem>>, vector<8x128xf32>,
    } else {
    }
    %c0 = arith.constant 0 : index
    %c0_1 = arith.constant 0 : index
    %3 = vector.load %arg4[%c0, %c0_1] : memref<8x128xf32, #tpu.memory_space<vmem>>, vector<8x128xf32>
    %c0_i32_2 = arith.constant 0 : i32
    %c128_i32 = arith.constant 128 : i32
    %4 = arith.muli %c0_i32_2, %c128_i32 : i32
    %5 = tpu.assume_multiple %4, 128 : i32
    %c0_3 = arith.constant 0 : index
    %6 = arith.index_cast %5 : i32 to index
    %7 = vector.load %arg2[%c0_3, %6] : memref<8x128xf32, #tpu.memory_space<vmem>>, vector<8x128xf32>
    %c0_4 = arith.constant 0 : index
    %8 = arith.index_cast %5 : i32 to index
    %9 = vector.load %arg3[%c0_4, %8] : memref<8x128xf32, #tpu.memory_space<vmem>>, vector<8x128xf32>
    %cst = arith.constant 0.000000e+00 : f32
    %10 = vector.broadcast %cst : f32 to vector<8x128xf32>
    %11 = arith.maximumf %7, %10 : vector<8x128xf32>
    %12 = arith.mulf %7, %9 : vector<8x128xf32>
    %13 = arith.subf %11, %12 : vector<8x128xf32>
    %14 = math.absf %7 : vector<8x128xf32>
    %cst_5 = arith.constant 0.000000e+00 : f32
    %15 = vector.broadcast %cst_5 : f32 to vector<8x128xf32>
    %16 = arith.subf %15, %14 : vector<8x128xf32>
    %17 = math.exp %16 : vector<8x128xf32>
    %18 = math.log1p %17 : vector<8x128xf32>
    %19 = arith.addf %13, %18 : vector<8x128xf32>
    %20 = arith.addf %3, %19 : vector<8x128xf32>
    %c1_i32 = arith.constant 1 : i32
    %c0_6 = arith.constant 0 : index
    %c0_7 = arith.constant 0 : index
    %21 = vector.load %arg4[%c0_6, %c0_7] : memref<8x128xf32, #tpu.memory_space<vmem>>, vector<8x128xf32>
    tpu.vector_store %arg4[%c0_6, %c0_7], %20 {strides = array<i32>} : memref<8x128xf32, #tpu.memory_space<vmem>>, vector<8x128xf32>,
    return
  }
  func.func @transform_0(%arg0: i32, %arg1: i32) -> (i32, i32) {
    %c0_i32 = arith.constant 0 : i32
    return %arg0, %arg1 : i32, i32
  }
  func.func @transform_1(%arg0: i32, %arg1: i32) -> (i32, i32) {
    %c0_i32 = arith.constant 0 : i32
    return %arg0, %arg1 : i32, i32
  }
  func.func @transform_2(%arg0: i32, %arg1: i32) -> (i32, i32) {
    %c0_i32 = arith.constant 0 : i32
    %c0_i32_0 = arith.constant 0 : i32
    return %arg0, %c0_i32 : i32, i32
  }
}

</mosaic_0001>

<bundles_post_ra>
// kernel: tpu_custom_call.1
= control target key start
LH: loop header
LB: loop body
LE: loop exit
PB: predicated region body
PF: predicated region fallthrough
CT: control target
= control target key end

     0   :  { %7 = vsyncpa [#allocation3], 0  ;;  %s837_s0 = inlined_call_operand.hbm [shape: f32[16,128], index: 0, kind: input, shape index: {}]   ;;  %s838_s1 = inlined_call_operand.hbm [shape: f32[16,128], index: 1, kind: input, shape index: {}]   ;;  %s839_s2 = inlined_call_operand.hbm [shape: f32[16,128], index: 2, kind: output, shape index: {}]  }
   0x1   :  { %9 = vsyncpa [#allocation3 + $0x1], 0 }
   0x2   :  { %10 = vsyncpa [#allocation6], 0 }
   0x3   :  { %12 = vsyncpa [#allocation6 + $0x1], 0 }
   0x4   :  { %13 = vsyncpa [#allocation4], 0 }
   0x5   :  { %15 = vsyncpa [#allocation4 + $0x1], 0  ;;  %s612_s9 = smov 0   ;;  %s614_s10 = smov 0  }
   0x6   :  { %s616_s11 = smov 0   ;;  %s618_s12 = smov 0  }
   0x7   :  { %s620_s13 = smov 0   ;;  %s622_s14 = smov 0  }
   0x8 LB: > { %s358_s15 = sadd.s32 4294967295, %s592_s14   ;;  %s359_s16 = sadd.s32 4294967294, %s592_s14   ;;  %s592_s14 = sphi %s622_s14, %s21_s14   ;;  %s588_s13 = sphi %s620_s13, %s859_s13   ;;  %s584_s12 = sphi %s618_s12, %s858_s12   ;;  %s580_s11 = sphi %s616_s11, %s857_s11   ;;  %s576_s10 = sphi %s614_s10, %s856_s10   ;;  %s572_s9 = sphi %s612_s9, %s855_s9  }
   0x9   : > { %s33_s17 = sadd.s32 1, %s588_s13  ;;  %s42_s18 = sadd.s32 1, %s580_s11 }
   0xa   : > { %p35_p0 = scmp.ge.s32.totalorder %s33_s17, 2  ;;  %p49_p1 = scmp.ne.s32.totalorder %s580_s11, %s576_s10 }
   0xb   : > { %p50_p2 = scmp.eq.s32.totalorder %s592_s14, 0  ;;  %p55_p3 = scmp.ne.s32.totalorder %s576_s10, %s572_s9 }
   0xc   : > { %s861_s17 = smov (%p35_p0, %s33_s17), 0  ;;  %p56_p5 = scmp.eq.s32.totalorder %s358_s15, 0 }
   0xd   : > { %p653_p4 = por %p50_p2, %p49_p1  ;;  %s37_s20 = ssub.s32 %s588_s13, %s861_s17 }
   0xe   : > { %p107_p6 = scmp.eq.s32.totalorder %s358_s15, 1  ;;  %p40_p7 = scmp.eq.s32.totalorder %s37_s20, 0 }
   0xf   : > { %p659_p8 = por %p56_p5, %p55_p3  ;;  %p113_p10 = scmp.eq.s32.totalorder %s359_s16, 1 }
  0x10   : > { %p663_p9 = por %p107_p6, %p49_p1  ;;  %p391_p13 = scmp.lt.s32.totalorder %s592_s14, 2 }
  0x11   : > { %s843_s21 = scalar_select %p659_p8, 1, 0 }
  0x12   : > { %s844_s22 = scalar_select %p663_p9, 1, 0 }
  0x13   : > { %s668_s23 = scalar_select %p40_p7, %s580_s11, %s42_s18  }
  0x14   : > { %p670_p11 = por %p113_p10, %p55_p3  ;;  %s677_s25 = sand.u32 1, %s580_s11  }
  0x15   : > { %s362_s26 = sshll.u32 %s677_s25, 3  ;;  %s363_s27 = sshll.u32 %s588_s13, 7 }
  0x16   : > { %s845_s24 = scalar_select %p670_p11, 1, 0 }
  0x17   : > { %s686_s30 = scalar_lea.hbm %s837_s0, %s363_s27  ;;  %s137_s3 = scalar_lea.vmem [#allocation2], %s362_s26 }
  0x18   : > { %s145_s4 = sshll.u32 %s137_s3, 4  ;;  %p694_p0 = pnand %p391_p13, %p653_p4  ;;  %s690_s4 = int_to_ptr.vmem [resolvable:$true] %s145_s4 }
  0x19   : > { %s134_s6 = scalar_lea.sflag [#allocation3], %s677_s25  ;;  %s446_s7 = scalar_lea.hbm %s686_s30, 128 }
  0x1a   : > { %p447_p3 = scmp.ne.s32.totalorder %s686_s30, %s446_s7  ;;  %p448_p5 = pneg %p694_p0 }
  0x1b   : > { %s451_s16 = scalar_lea.hbm %s837_s0, 256  ;;  %p452_p4 = scmp.lt.u32.totalorder %s686_s30, %s837_s0 }
  0x1c   : > { %p449_p6 = pnand %p448_p5, %p447_p3  ;;  %p453_p10 = scmp.lt.u32.totalorder %s451_s16, %s446_s7 }
  0x1d   : > { %p455_p12 = scmp.lt.u32.totalorder %s446_s7, %s686_s30 }
  0x1e   : > { %p450_p7 = pneg %p449_p6  ;;  %p454_p13 = por %p453_p10, %p452_p4 }
  0x20   : > { %p456_p1 = por %p455_p12, %p454_p13 }
  0x22   : > { %p457_p2 = pnand %p456_p1, %p450_p7 }
  0x24   : > { %460 = shalt.err (!%p457_p2)
}
  0x25   : > { %s461_s20 = scalar_lea.vmem %s690_s4, 128  ;;  %s594_s28 = smov [#allocation2]  }
  0x26   : > { %p462_p3 = scmp.ne.s32.totalorder %s690_s4, %s461_s20  ;;  %s466_s29 = sshll.u32 %s594_s28, 4  ;;  %s467_s29 = int_to_ptr.vmem [resolvable:$false] %s466_s29 }
  0x27   : > { %s468_s3 = scalar_lea.vmem %s467_s29, 256  ;;  %p469_p9 = scmp.lt.s32.totalorder %s690_s4, %s467_s29 }
  0x28   : > { %p464_p6 = pnand %p462_p3, %p448_p5  ;;  %p470_p4 = scmp.lt.s32.totalorder %s468_s3, %s461_s20 }
  0x2a   : > { %p465_p11 = pneg %p464_p6  ;;  %p471_p10 = por %p470_p4, %p469_p9 }
  0x2c   : > { %p472_p12 = pnand %p471_p10, %p465_p11 }
  0x2e   : > { %475 = shalt.err (!%p472_p12)
}
  0x2f   : > { %383 = dma.hbm_to_vmem [thread:$0]  (!%p694_p0), %s686_s30, 128, %s690_s4, %s134_s6  }
  0x30   : > { %p847_p1 = scmp.lt.s32.totalorder %s592_s14, 3  ;;  %p848_p2 = scmp.ge.s32.totalorder %s592_s14, 1 }
  0x31   : > { %s739_s16 = scalar_lea.hbm %s838_s1, %s363_s27  ;;  %s156_s18 = scalar_lea.vmem [#allocation5], %s362_s26 }
  0x32   : > { %p730_p7 = pnand %p848_p2, %p847_p1  ;;  %s164_s19 = sshll.u32 %s156_s18, 4  ;;  %s165_s19 = int_to_ptr.vmem [resolvable:$true] %s164_s19 }
  0x33   : > { %s153_s30 = scalar_lea.sflag [#allocation6], %s677_s25  ;;  %s476_s4 = scalar_lea.hbm %s739_s16, 128 }
  0x34   : > { %s849_s7 = scalar_select %p730_p7, 1, 0 }
  0x35   : > { %p477_p9 = scmp.ne.s32.totalorder %s739_s16, %s476_s4  ;;  %s481_s27 = scalar_lea.hbm %s838_s1, 256 }
  0x36   : > { %p482_p3 = scmp.lt.u32.totalorder %s739_s16, %s838_s1  ;;  %p483_p6 = scmp.lt.u32.totalorder %s481_s27, %s476_s4 }
  0x37   : > { %p479_p11 = pnand %p477_p9, %p448_p5  ;;  %p485_p10 = scmp.lt.u32.totalorder %s476_s4, %s739_s16 }
  0x38   : > { %p484_p4 = por %p483_p6, %p482_p3 }
  0x39   : > { %p480_p13 = pneg %p479_p11 }
  0x3a   : > { %p486_p12 = por %p485_p10, %p484_p4 }
  0x3c   : > { %p487_p1 = pnand %p486_p12, %p480_p13 }
  0x3e   : > { %490 = shalt.err (!%p487_p1)
}
  0x3f   : > { %s491_s25 = scalar_lea.vmem %s165_s19, 128  ;;  %s595_s26 = smov [#allocation5]  }
  0x40   : > { %p492_p2 = scmp.ne.s32.totalorder %s165_s19, %s491_s25  ;;  %s496_s3 = sshll.u32 %s595_s26, 4  ;;  %s497_s3 = int_to_ptr.vmem [resolvable:$false] %s496_s3 }
  0x41   : > { %s498_s8 = scalar_lea.vmem %s497_s3, 256  ;;  %p499_p8 = scmp.lt.s32.totalorder %s165_s19, %s497_s3 }
  0x42   : > { %p494_p9 = pnand %p492_p2, %p448_p5  ;;  %p500_p7 = scmp.lt.s32.totalorder %s498_s8, %s491_s25 }
  0x44   : > { %p495_p11 = pneg %p494_p9  ;;  %p501_p3 = por %p500_p7, %p499_p8 }
  0x46   : > { %p502_p6 = pnand %p501_p3, %p495_p11 }
  0x48   : > { %505 = shalt.err (!%p502_p6)
}
  0x49   : > { %386 = dma.hbm_to_vmem [thread:$0]  (!%p694_p0), %s739_s16, 128, %s165_s19, %s153_s30  }
  0x4a   : > { %p850_p13 = scmp.ne.s32.totalorder %s849_s7, 0 }
  0x4b   : > { %s766_s15 = sand.u32 (!%p850_p13), 1, %s576_s10   ;;  %p851_p8 = scmp.ne.s32.totalorder (!%p850_p13), %s843_s21, 0 }
  0x4c   : > { %173 = sbr.rel (%p850_p13) target bundleno = 136 (0x88), region = 28  ;;  %s769_s18 = sshll.u32 (!%p850_p13), %s766_s15, 3 }
  0x4d   : > { %s176_s4 = scalar_lea.sflag (!%p850_p13), [#allocation3], %s766_s15  ;;  %s179_s6 = scalar_lea.vmem (!%p850_p13), [#allocation2], %s769_s18 }
  0x53   : > { %559 = dma.done.wait (%p851_p8), %s176_s4, 128  }
  0x54   : > { %561 = vsyncadd (%p851_p8), %s176_s4, 4294967168  ;;  %s185_s5 = scalar_lea.sflag [#allocation6], %s766_s15  ;;  %s188_s7 = scalar_lea.vmem [#allocation5], %s769_s18 }
  0x55   : > { %563 = dma.done.wait (%p851_p8), %s185_s5, 128  }
  0x56   : > { %565 = vsyncadd (%p851_p8), %s185_s5, 4294967168  ;;  %v220_v0 = vld [vmem:[%s179_s6] sm:$0xff]  ;;  %v221_v7 = vld [vmem:[%s188_s7] sm:$0xff]  ;;  %s371_s21 = sshll.u32 %s584_s12, 7  ;;  %s213_s16 = scalar_lea.vmem [#allocation7], %s769_s18 }
  0x57   : > { %v225_v1 = vand.u32 2147483647, %v220_v0  ;;  %v222_v9 = vmax.f32 %v220_v0, 0.0  ;;  %v223_v10 = vmul.f32 %v221_v7, %v220_v0  ;;  %s255_s19 = sshll.u32 %s213_s16, 4  ;;  %s788_s27 = scalar_lea.hbm %s839_s2, %s371_s21  ;;  %s790_s19 = int_to_ptr.vmem [resolvable:$true] %s255_s19 }
  0x58   : > { %s242_s28 = scalar_lea.sflag [#allocation4], %s766_s15  ;;  %s506_s29 = scalar_lea.vmem %s790_s19, 128 }
  0x59   : > { %v226_v2 = vsub.f32 0.0, %v225_v1  ;;  %v224_v14 = vsub.f32 %v222_v9, %v223_v10  ;;  %p507_p0 = scmp.ne.s32.totalorder %s790_s19, %s506_s29  ;;  %p852_p5 = scmp.ne.s32.totalorder %s844_s22, 0 }
  0x5a   : > { %s596_s12 = smov [#allocation7]  }
  0x5b   : > { %v227_v3 = vmul.f32 1.442695, %v226_v2  ;;  %p508_p7 = pnand %p507_p0, %p852_p5  ;;  %s510_s25 = sshll.u32 %s596_s12, 4  ;;  %s511_s25 = int_to_ptr.vmem [resolvable:$false] %s510_s25 }
  0x5c   : > { %s512_s26 = scalar_lea.vmem %s511_s25, 256  ;;  %p513_p10 = scmp.lt.s32.totalorder %s790_s19, %s511_s25 }
  0x5d   : > { %442 = vpow2.f32 %v227_v3  ;;  %p509_p4 = pneg %p508_p7  ;;  %p514_p12 = scmp.lt.s32.totalorder %s512_s26, %s506_s29 }
  0x5f   : > { %p515_p1 = por %p514_p12, %p513_p10 }
  0x61   : > { %p516_p2 = pnand %p515_p1, %p509_p4 }
  0x67   : > { %v443_v4 = vpop.eup %442 }
  0x68   : > { %v229_v5 = vadd.f32 1.0, %v443_v4  ;;  %v232_v6 = vmul.f32 -0.5, %v443_v4  ;;  %v235_v11 = vand.u32 2147483647, %v443_v4 }
  0x6a   : > { %444 = vlog2.f32 %v229_v5  ;;  %v233_v8 = vadd.f32 1.0, %v232_v6  ;;  %vm236_vm0 = vcmp.lt.f32.partialorder %v235_v11, 0.0004427343 }
  0x6c   : > { %v234_v12 = vmul.f32 %v443_v4, %v233_v8 }
  0x74   : > { %v445_v13 = vpop.eup %444 }
  0x75   : > { %v231_v15 = vmul.f32 0.6931472, %v445_v13 }
  0x77   : > { %v237_v16 = vsel %vm236_vm0, %v234_v12, %v231_v15 }
  0x78   : > { %v238_v17 = vadd.f32 %v237_v16, %v224_v14 }
  0x7a   : > { %240 = vst [vmem:[%s213_s16] sm:$0xff] %v238_v17 }
  0x7b   : > { %519 = shalt.err (!%p516_p2)
}
  0x7c   : > { %s520_s3 = scalar_lea.hbm %s788_s27, 128  ;;  %s524_s18 = scalar_lea.hbm %s839_s2, 256 }
  0x7d   : > { %p521_p9 = scmp.ne.s32.totalorder %s788_s27, %s520_s3  ;;  %p525_p6 = scmp.lt.u32.totalorder %s788_s27, %s839_s2 }
  0x7e   : > { %p526_p13 = scmp.lt.u32.totalorder %s524_s18, %s520_s3  ;;  %p528_p0 = scmp.lt.u32.totalorder %s520_s3, %s788_s27 }
  0x7f   : > { %p522_p11 = pnand %p521_p9, %p852_p5 }
  0x80   : > { %p527_p8 = por %p526_p13, %p525_p6 }
  0x81   : > { %p523_p3 = pneg %p522_p11 }
  0x82   : > { %p529_p7 = por %p528_p0, %p527_p8 }
  0x84   : > { %p530_p4 = pnand %p529_p7, %p523_p3 }
  0x86   : > { %533 = shalt.err (!%p530_p4)
}
  0x87   : > { %378 = dma.vmem_to_hbm [thread:$0]  (%p852_p5), %s790_s19, 128, %s788_s27, %s242_s28  }
  0x88 PF: > { %s267_s5 = sand.u32 1, %s572_s9   ;;  %p853_p10 = scmp.ne.s32.totalorder %s845_s24, 0 }
  0x89   : > { %p854_p12 = scmp.ge.s32.totalorder %s592_s14, 2  ;;  %s268_s7 = scalar_lea.sflag [#allocation4], %s267_s5 }
  0x8b   : > { %p388_p1 = pnand %p854_p12, %p853_p10 }
  0x8d   : > { %567 = dma.done.wait (!%p388_p1), %s268_s7, 128  }
  0x8e   : > { %569 = vsyncadd (!%p388_p1), %s268_s7, 4294967168  ;;  %s21_s14 = sadd.s32 1, %s592_s14   ;;  %s855_s9 = smov %s576_s10 }
  0x8f   : > { %p18_p2 = scmp.ge.s32.totalorder %s21_s14, 4   ;;  %s856_s10 = smov %s580_s11 }
  0x90   : > { %s857_s11 = smov %s668_s23  ;;  %s858_s12 = smov %s588_s13 }
  0x91   : > { %s859_s13 = smov %s861_s17  ;;  %20 = sbr.rel (!%p18_p2) target bundleno = 8 (0x8), region = 90 }
  0x98   :  { %273 = vsyncpa [#allocation3], 1 }
  0x99   :  { %275 = vsyncpa [#allocation3 + $0x1], 1 }
  0x9a   :  { %276 = vsyncpa [#allocation6], 1 }
  0x9b   :  { %278 = vsyncpa [#allocation6 + $0x1], 1 }
  0x9c   :  { %279 = vsyncpa [#allocation4], 1 }
  0x9d   :  { %281 = vsyncpa [#allocation4 + $0x1], 1 }

</bundles_post_ra>
